<compile_context>
chip_gen: v7x
topology: tpu7x:2x2x1
jax: 0.10.0
libtpu: 0.0.40
codegen_flags: <defaults>
</compile_context>

<pallas_src>
import jax
import jax.numpy as jnp
from jax.experimental import pallas as pl
from jax.experimental.pallas import tpu as pltpu


_LANES = 128
# ~2 MiB per tile buffer -> in+out double-buffered ~= 8 MiB VMEM, safe on
# v5e/v6e (128 MiB) and v7x (64 MiB physical / 32 MiB default scoped).
_TARGET_TILE_BYTES = 2 * 1024 * 1024


def _sublane_multiple(*dtypes):
    """Second-minor tiling multiple: 8 for 4-byte, 16 for 2-byte, 32 for 1-byte."""
    min_itemsize = min(jnp.dtype(d).itemsize for d in dtypes)
    return max(8, 32 // max(1, min_itemsize))


def _make_lambda_kernel(func):
    """Pallas kernel body applying `func` element-wise to the current tile."""
    def kernel(x_ref, o_ref):
        o_ref[...] = func(x_ref[...]).astype(o_ref.dtype)
    return kernel


def _apply_elementwise_pallas(func, flat, out_dtype, cols, sub):
    """Apply `func` over a lane-dense 2-D slab with a pipelined, tiled grid."""
    n = flat.shape[0]
    rows = n // cols                      # guaranteed: n % (sub * cols) == 0
    x2d = flat.reshape(rows, cols)

    itemsize = max(jnp.dtype(flat.dtype).itemsize, jnp.dtype(out_dtype).itemsize)
    target_rows = max(sub, _TARGET_TILE_BYTES // (cols * itemsize))
    tr = min(rows, (target_rows // sub) * sub)
    tr = max(sub, tr)

    grid = (pl.cdiv(rows, tr),)

    out2d = pl.pallas_call(
        _make_lambda_kernel(func),
        out_shape=jax.ShapeDtypeStruct((rows, cols), out_dtype),
        grid_spec=pl.GridSpec(
            grid=grid,
            in_specs=[pl.BlockSpec((tr, cols), lambda i: (i, 0))],
            out_specs=pl.BlockSpec((tr, cols), lambda i: (i, 0)),
        ),
        compiler_params=pltpu.CompilerParams(
            dimension_semantics=("parallel",),
        ),
    )(x2d)
    return out2d.reshape(-1)


class LambdaLayer:
    """Pallas-backed equivalent of the PyTorch LambdaLayer for element-wise func."""

    def __init__(self, func):
        self.func = func

    def __call__(self, x):
        x = jnp.asarray(x)

        # Derive the output aval; only shape-preserving funcs go through Pallas.
        out_aval = jax.eval_shape(
            self.func, jax.ShapeDtypeStruct(x.shape, x.dtype)
        )
        if (
            out_aval.shape != x.shape
            or x.size == 0
            or jnp.dtype(out_aval.dtype) == jnp.dtype(jnp.bool_)
        ):
            # TODO(synk): non-elementwise / bool-producing funcs: plain JAX fallback.
            return self.func(x)

        out_dtype = out_aval.dtype
        sub = _sublane_multiple(x.dtype, out_dtype)
        total = x.size

        # Widest lane-dense column count that still yields >= 1 full row-group.
        cols = None
        for c in (8 * _LANES, 4 * _LANES, 2 * _LANES, _LANES):
            if total >= sub * c:
                cols = c
                break
        if cols is None:
            # Tiny input: launch + DMA setup can never win; let XLA fuse it.
            return self.func(x)

        unit = sub * cols
        n_aligned = (total // unit) * unit

        flat = x.reshape(-1)
        main = _apply_elementwise_pallas(
            self.func, flat[:n_aligned], out_dtype, cols, sub
        )
        if n_aligned == total:
            return main.reshape(x.shape)

        # Tiny unaligned tail (< sub*cols elems): plain jnp, no pad round trips.
        tail = self.func(flat[n_aligned:]).astype(out_dtype)
        return jnp.concatenate([main, tail]).reshape(x.shape)


if __name__ == "__main__":
    key = jax.random.PRNGKey(0)
    # NCHW input, small shapes: batch=2, channels=4, spatial=16x16.
    x = jax.random.normal(key, (2, 4, 16, 16), dtype=jnp.float32)

    # Representative element-wise lambda (e.g. LambdaLayer(lambda x: F.relu(x))).
    func = lambda t: jnp.maximum(t, 0.0)

    layer = LambdaLayer(func)
    out = jax.block_until_ready(layer(x))

    # Reference check against plain JAX application of the same func.
    ref = func(x)
    assert out.shape == ref.shape and out.dtype == ref.dtype
    assert jnp.allclose(out, ref), "mismatch vs reference"

    print("KERNEL_OK")
</pallas_src>

<mosaic_0001>
module attributes {stable_mosaic.version = 11 : i64} {
  func.func @kernel(%arg0: i32, %arg1: memref<8x256xf32, #tpu.memory_space<vmem>>, %arg2: memref<8x256xf32, #tpu.memory_space<vmem>>) attributes {dimension_semantics = [#tpu.dimension_semantics<parallel>], iteration_bounds = array<i64: 1>, scalar_prefetch = 0 : i64, scratch_operands = 0 : i64, tpu.core_type = #tpu.core_type<tc>, window_params = [{transform_indices = @transform_0, window_bounds = array<i64: 8, 256>}, {transform_indices = @transform_1, window_bounds = array<i64: 8, 256>}]} {
    %c0 = arith.constant 0 : index
    %c0_0 = arith.constant 0 : index
    %0 = vector.load %arg1[%c0, %c0_0] : memref<8x256xf32, #tpu.memory_space<vmem>>, vector<8x256xf32>
    %cst = arith.constant 0.000000e+00 : f32
    %1 = vector.broadcast %cst : f32 to vector<8x256xf32>
    %2 = arith.maximumf %0, %1 : vector<8x256xf32>
    %c0_1 = arith.constant 0 : index
    %c0_2 = arith.constant 0 : index
    %3 = vector.load %arg2[%c0_1, %c0_2] : memref<8x256xf32, #tpu.memory_space<vmem>>, vector<8x256xf32>
    tpu.vector_store %arg2[%c0_1, %c0_2], %2 {strides = array<i32>} : memref<8x256xf32, #tpu.memory_space<vmem>>, vector<8x256xf32>,
    return
  }
  func.func @transform_0(%arg0: i32) -> (i32, i32) {
    %c0_i32 = arith.constant 0 : i32
    %c0_i32_0 = arith.constant 0 : i32
    return %arg0, %c0_i32 : i32, i32
  }
  func.func @transform_1(%arg0: i32) -> (i32, i32) {
    %c0_i32 = arith.constant 0 : i32
    %c0_i32_0 = arith.constant 0 : i32
    return %arg0, %c0_i32 : i32, i32
  }
}

</mosaic_0001>

<bundles_post_ra>
// kernel: tpu_custom_call.1
= control target key start
LH: loop header
LB: loop body
LE: loop exit
PB: predicated region body
PF: predicated region fallthrough
CT: control target
= control target key end

     0   :  { %6 = vsyncpa [#allocation3], 0  ;;  %s128_s0 = inlined_call_operand.hbm [shape: f32[8,256], index: 0, kind: input, shape index: {}]   ;;  %s129_s1 = inlined_call_operand.hbm [shape: f32[8,256], index: 1, kind: output, shape index: {}]  }
   0x1   :  { %7 = vsyncpa [#allocation4], 0  ;;  %s92_s6 = smov [#allocation2]   ;;  %s44_s10 = scalar_lea.hbm %s128_s0, 256 }
   0x2   :  { %s14_s7 = sshll.u32 %s92_s6, 4  ;;  %p45_p0 = scmp.ne.s32.totalorder %s128_s0, %s44_s10  ;;  %s15_s7 = int_to_ptr.vmem [resolvable:$true] %s14_s7 }
   0x3   :  { %p48_p1 = scmp.lt.u32.totalorder %s44_s10, %s128_s0 }
   0x5   :  { %p50_p2 = pnand %p48_p1, %p45_p0 }
   0x7   :  { %53 = shalt.err (!%p50_p2)
}
   0x8   :  { %s54_s15 = scalar_lea.vmem %s15_s7, 256  ;;  %p59_p4 = scmp.lt.s32.totalorder %s15_s7, %s15_s7 }
   0x9   :  { %p55_p3 = scmp.ne.s32.totalorder %s15_s7, %s54_s15  ;;  %p60_p5 = scmp.lt.s32.totalorder %s54_s15, %s54_s15 }
   0xb   :  { %p61_p6 = por %p60_p5, %p59_p4 }
   0xd   :  { %p62_p7 = pnand %p61_p6, %p55_p3 }
   0xf   :  { %65 = shalt.err (!%p62_p7)
}
  0x10   :  { %17 = dma.hbm_to_vmem [thread:$0]  %s128_s0, 256, %s15_s7, [#allocation3]  }
  0x11   :  { %88 = dma.done.wait [#allocation3], 256  }
  0x12   :  { %89 = vsyncadd [#allocation3], 4294967040  ;;  %s93_s18 = smov [#allocation5]   ;;  %v21_v0 = vld [vmem:[#allocation2] sm:$0xff]  ;;  %v22_v1 = vld [vmem:[#allocation2 + $0x8] sm:$0xff] }
  0x13   :  { %s33_s19 = sshll.u32 %s93_s18, 4  ;;  %v23_v2 = vmax.f32 %v21_v0, 0.0  ;;  %v24_v3 = vmax.f32 %v22_v1, 0.0  ;;  %s34_s19 = int_to_ptr.vmem [resolvable:$true] %s33_s19 }
  0x14   :  { %s66_s20 = scalar_lea.vmem %s34_s19, 256  ;;  %p71_p9 = scmp.lt.s32.totalorder %s34_s19, %s34_s19 }
  0x15   :  { %25 = vst [vmem:[#allocation5] sm:$0xff] %v23_v2  ;;  %26 = vst [vmem:[#allocation5 + $0x8] sm:$0xff] %v24_v3  ;;  %p67_p8 = scmp.ne.s32.totalorder %s34_s19, %s66_s20  ;;  %p72_p10 = scmp.lt.s32.totalorder %s66_s20, %s66_s20 }
  0x17   :  { %p73_p11 = por %p72_p10, %p71_p9 }
  0x19   :  { %p74_p12 = pnand %p73_p11, %p67_p8 }
  0x1b   :  { %77 = shalt.err (!%p74_p12)
}
  0x1c   :  { %s78_s22 = scalar_lea.hbm %s129_s1, 256 }
  0x1d   :  { %p79_p13 = scmp.ne.s32.totalorder %s129_s1, %s78_s22  ;;  %p82_p0 = scmp.lt.u32.totalorder %s78_s22, %s129_s1 }
  0x1f   :  { %p84_p1 = pnand %p82_p0, %p79_p13 }
  0x21   :  { %87 = shalt.err (!%p84_p1)
}
  0x22   :  { %36 = dma.vmem_to_hbm [thread:$0]  %s34_s19, 256, %s129_s1, [#allocation4]  }
  0x23   :  { %90 = dma.done.wait [#allocation4], 256  }
  0x24   :  { %91 = vsyncadd [#allocation4], 4294967040 }
  0x25   :  { %40 = vsyncpa [#allocation3], 1 }
  0x26   :  { %41 = vsyncpa [#allocation4], 1 }

</bundles_post_ra>
